<compile_context>
chip_gen: v7x
topology: tpu7x:2x2x1
jax: 0.10.0
libtpu: 0.0.40
codegen_flags: <defaults>
</compile_context>

<pallas_src>
import functools
import math

import jax
import jax.numpy as jnp
from jax import lax
from jax.experimental import pallas as pl
from jax.experimental.pallas import tpu as pltpu

ALPHA = 0.2          # LeakyReLU slope
NEG_BIG = -9e15      # mask fill value (matches the torch code)
BN_EPS = 1e-5
LANE = 128
SUBLANE = 8


def _round_up(x, m):
    return ((x + m - 1) // m) * m


def _pad_axis(x, axis, target):
    pad = target - x.shape[axis]
    if pad <= 0:
        return x
    widths = [(0, 0)] * x.ndim
    widths[axis] = (0, pad)
    return jnp.pad(x, widths)


def _vmem_limit(estimate_bytes):
    # explicit scoped-VMEM budget: generous headroom, capped at v7x physical.
    return int(min(64 << 20, max(32 << 20, 2 * estimate_bytes)))


def _pick_batch_tile(B, per_batch_bytes, budget_bytes=8 << 20):
    """Largest divisor of B fitting the VMEM budget; prefer >=2 grid steps."""
    bt = max(1, min(B, budget_bytes // max(per_batch_bytes, 1)))
    while B % bt:
        bt -= 1
    if bt == B and B > 1:            # keep >=2 parallel grid steps (v7x megacore)
        for cand in range(B // 2, 0, -1):
            if B % cand == 0:
                bt = cand
                break
    return bt


# ----------------------------------------------------------------------------
# Kernel 1: GAT attention with a precomputed edge-score bias.
#   Wh = h @ W ; e = leakyrelu(Wh@a1 + (Wh@a2)^T + edge) ;
#   masked softmax over neighbours ; h' = attn @ Wh.
# ----------------------------------------------------------------------------
def attn_kernel(h_ref, edge_ref, mask_ref, w_ref, a1_ref, a2_ref, out_ref):
    bt, N, _ = edge_ref.shape

    # One flattened-M MXU matmul for the node projection: (bt*N, Din)@(Din, Dp).
    Wh2d = jnp.dot(h_ref[...], w_ref[...], preferred_element_type=jnp.float32)
    Dp = Wh2d.shape[1]
    Wh = Wh2d.reshape(bt, N, Dp)                      # layout-free: N % 8 == 0

    # "column" score term (Wh @ a1): lane reduce, no reshuffle needed.
    a1 = a1_ref[...].reshape(1, 1, Dp)
    Wh1 = jnp.sum(Wh * a1, axis=-1, keepdims=True)    # (bt, N, 1)

    # "row" score term produced directly in (bt, 1, N) layout (no transpose).
    a2b = jnp.broadcast_to(a2_ref[...].reshape(1, 1, Dp), (bt, 1, Dp))
    Wh2_row = jnp.einsum("bod,bnd->bon", a2b, Wh,
                         preferred_element_type=jnp.float32)       # (bt, 1, N)

    e = Wh1 + Wh2_row + edge_ref[...]
    e = jnp.where(e >= 0, e, ALPHA * e)                            # LeakyReLU
    s = jnp.where(mask_ref[...] > 0, e, jnp.float32(NEG_BIG))

    m = jnp.max(s, axis=-1, keepdims=True)
    p = jnp.exp(s - m)
    denom = jnp.sum(p, axis=-1, keepdims=True)
    inv = pl.reciprocal(denom, approx=True)           # EUP slot
    inv = inv * (2.0 - denom * inv)                   # one Newton step -> f32 accurate
    attn = p * inv
    # dropout(p=0) == identity

    hp = jnp.einsum("bij,bjd->bid", attn, Wh,
                    preferred_element_type=jnp.float32)            # (bt, N, Dp)
    out_ref[...] = hp.reshape(bt * N, Dp)


# ----------------------------------------------------------------------------
# Kernel 2: ALL LightweightResidualBlocks fused, on flattened (B*N, Dp) rows.
# Conv1d(k=3,pad=1) taps via pltpu.roll + batch-boundary masking, three taps
# merged into one concat-K MXU matmul; training-mode BatchNorm folded into a
# per-channel scale/shift.  Emits only the unpadded channel width.
# ----------------------------------------------------------------------------
def resnet_kernel(x_ref, w1_ref, w2_ref, g1_ref, b1_ref, g2_ref, b2_ref,
                  out_ref, *, seq_len):
    x = x_ref[...]                                    # (BN, Dp)
    rows_total = x.shape[0]
    num_blocks = w1_ref.shape[0]

    # batch-boundary masks from a narrow (BN, 1) iota.
    r = lax.broadcasted_iota(jnp.int32, (rows_total, 1), 0) % seq_len
    is_first = r == 0
    is_last = r == (seq_len - 1)

    def conv3(z, wcat):
        # roll(+1): row i <- row i-1 ; roll(total-1) == roll(-1): row i <- row i+1
        zp = jnp.where(is_first, 0.0, pltpu.roll(z, 1, 0))
        zn = jnp.where(is_last, 0.0, pltpu.roll(z, rows_total - 1, 0))
        zcat = jnp.concatenate([zp, z, zn], axis=1)   # (BN, 3*Dp)
        return jnp.dot(zcat, wcat, preferred_element_type=jnp.float32)

    def bn(y, g, b):
        mean = jnp.mean(y, axis=0, keepdims=True)
        var = jnp.maximum(jnp.mean(y * y, axis=0, keepdims=True) - mean * mean, 0.0)
        scale = g * lax.rsqrt(var + BN_EPS)           # per-channel (1, Dp)
        shift = b - mean * scale
        return y * scale + shift

    for blk in range(num_blocks):                     # static unroll over blocks
        y = conv3(x, w1_ref[blk])
        y = jnp.maximum(bn(y, g1_ref[blk], b1_ref[blk]), 0.0)
        y = conv3(y, w2_ref[blk])
        y = bn(y, g2_ref[blk], b2_ref[blk])
        x = jnp.maximum(y + x, 0.0)                   # identity shortcut + ReLU

    out_ref[...] = x[:, :out_ref.shape[1]]            # unpadded width out


# ----------------------------------------------------------------------------
# Wrappers
# ----------------------------------------------------------------------------
def attention_pallas(h, mch_mask, comp_val, W, a, W_edge, d_pad, batch_tile=None):
    B, N, Din = h.shape
    Dout = W.shape[1]
    assert N % SUBLANE == 0, "sequence length must be a multiple of 8 (sublane tile)"

    Wp = _pad_axis(W, 1, d_pad)                                   # (Din, Dp)
    a1 = _pad_axis(jnp.transpose(a[:Dout]), 1, d_pad)             # (1, Dp)
    a2 = _pad_axis(jnp.transpose(a[Dout:2 * Dout]), 1, d_pad)     # (1, Dp)

    # Edge score term: comp_val @ (W_edge @ a3) is a length-Ein matvec; contract
    # it once in XLA so the kernel streams only (B, N, N) floats (Ein x less DMA).
    we_vec = (W_edge @ a[2 * Dout:])[:, 0]                        # (Ein,)
    edge = jnp.einsum("bijk,k->bij", comp_val, we_vec)            # (B, N, N)

    mask = mch_mask.astype(jnp.float32)
    h2d = h.reshape(B * N, Din)

    per_batch_bytes = 4 * N * (Din + 2 * N + 2 * d_pad)
    bt = batch_tile if batch_tile is not None else _pick_batch_tile(B, per_batch_bytes)
    assert B % bt == 0

    flops = int(2 * B * N * Din * d_pad + 4 * B * N * d_pad
                + 2 * B * N * N * d_pad + 8 * B * N * N)
    bytes_acc = int(4 * (B * N * Din + 2 * B * N * N + Din * d_pad
                         + 2 * d_pad + B * N * d_pad))
    est_vmem = (2 * 4 * bt * N * (Din + 2 * N + d_pad)
                + 2 * 4 * (Din * d_pad + 2 * d_pad)
                + 4 * bt * N * (3 * d_pad + 3 * N))

    return pl.pallas_call(
        attn_kernel,
        out_shape=jax.ShapeDtypeStruct((B * N, d_pad), jnp.float32),
        grid=(B // bt,),
        in_specs=[
            pl.BlockSpec((bt * N, Din), lambda g: (g, 0)),
            pl.BlockSpec((bt, N, N), lambda g: (g, 0, 0)),
            pl.BlockSpec((bt, N, N), lambda g: (g, 0, 0)),
            pl.BlockSpec((Din, d_pad), lambda g: (0, 0)),
            pl.BlockSpec((1, d_pad), lambda g: (0, 0)),
            pl.BlockSpec((1, d_pad), lambda g: (0, 0)),
        ],
        out_specs=pl.BlockSpec((bt * N, d_pad), lambda g: (g, 0)),
        compiler_params=pltpu.CompilerParams(
            dimension_semantics=("parallel",),
            vmem_limit_bytes=_vmem_limit(est_vmem)),
        cost_estimate=pl.CostEstimate(flops=flops,
                                      transcendentals=int(B * N * N + B * N),
                                      bytes_accessed=bytes_acc),
    )(h2d, edge, mask, Wp, a1, a2)


def resnet_blocks_pallas(x_flat, blocks, B, N, d_pad, out_dim):
    bn_rows = B * N
    nb = len(blocks)

    def _wcat(wT):   # (3, Dout, Dout) -> padded, taps concatenated along K
        return _pad_axis(_pad_axis(wT, 1, d_pad), 2, d_pad).reshape(3 * d_pad, d_pad)

    w1 = jnp.stack([_wcat(b["w1T"]) for b in blocks])             # (nb, 3Dp, Dp)
    w2 = jnp.stack([_wcat(b["w2T"]) for b in blocks])
    g1 = jnp.stack([_pad_axis(b["g1"], 1, d_pad) for b in blocks])  # (nb, 1, Dp)
    b1 = jnp.stack([_pad_axis(b["b1"], 1, d_pad) for b in blocks])
    g2 = jnp.stack([_pad_axis(b["g2"], 1, d_pad) for b in blocks])
    b2 = jnp.stack([_pad_axis(b["b2"], 1, d_pad) for b in blocks])

    flops = int(nb * (2 * 2 * bn_rows * 3 * d_pad * d_pad + 10 * bn_rows * d_pad))
    bytes_acc = int(4 * (bn_rows * d_pad + bn_rows * out_dim
                         + nb * (2 * 3 * d_pad * d_pad + 4 * d_pad)))
    est_vmem = (4 * 2 * bn_rows * d_pad
                + 4 * nb * (6 * d_pad * d_pad + 4 * d_pad)
                + 4 * bn_rows * 5 * d_pad)

    return pl.pallas_call(
        functools.partial(resnet_kernel, seq_len=N),
        out_shape=jax.ShapeDtypeStruct((bn_rows, out_dim), jnp.float32),
        grid=(1,),
        in_specs=[
            pl.BlockSpec((bn_rows, d_pad), lambda i: (0, 0)),
            pl.BlockSpec((nb, 3 * d_pad, d_pad), lambda i: (0, 0, 0)),
            pl.BlockSpec((nb, 3 * d_pad, d_pad), lambda i: (0, 0, 0)),
            pl.BlockSpec((nb, 1, d_pad), lambda i: (0, 0, 0)),
            pl.BlockSpec((nb, 1, d_pad), lambda i: (0, 0, 0)),
            pl.BlockSpec((nb, 1, d_pad), lambda i: (0, 0, 0)),
            pl.BlockSpec((nb, 1, d_pad), lambda i: (0, 0, 0)),
        ],
        out_specs=pl.BlockSpec((bn_rows, out_dim), lambda i: (0, 0)),
        compiler_params=pltpu.CompilerParams(
            dimension_semantics=("arbitrary",),
            vmem_limit_bytes=_vmem_limit(est_vmem)),
        cost_estimate=pl.CostEstimate(flops=flops,
                                      transcendentals=int(nb * 2 * d_pad),
                                      bytes_accessed=bytes_acc),
    )(x_flat, w1, w2, g1, b1, g2, b2)


def mch_attn_block_forward(h, mch_mask, comp_val, params):
    """Full MCH_AttnBlock forward.  Returns (B, N, output_dim)."""
    B, N, _ = h.shape
    Dout = params["W"].shape[1]
    d_pad = _round_up(Dout, LANE)

    x = attention_pallas(h, mch_mask, comp_val,
                         params["W"], params["a"], params["W_edge"], d_pad)
    if params["blocks"]:
        x = resnet_blocks_pallas(x, params["blocks"], B, N, d_pad, Dout)
    else:
        x = x[:, :Dout]
    return x.reshape(B, N, Dout)


# ----------------------------------------------------------------------------
# Deterministic parameter init (shapes match the PyTorch module __init__)
# ----------------------------------------------------------------------------
def init_params(key, node_dim, edge_dim, out_dim, num_blocks=1):
    k_w, k_we, k_a, k_blk = jax.random.split(key, 4)
    gain = 1.414
    lim_w = gain * math.sqrt(6.0 / (node_dim + out_dim))
    W = jax.random.uniform(k_w, (node_dim, out_dim), jnp.float32, -lim_w, lim_w)
    lim_we = gain * math.sqrt(6.0 / (edge_dim + out_dim))
    W_edge = jax.random.uniform(k_we, (edge_dim, out_dim), jnp.float32, -lim_we, lim_we)
    lim_a = gain * math.sqrt(6.0 / (3 * out_dim + 1))
    a = jax.random.uniform(k_a, (3 * out_dim, 1), jnp.float32, -lim_a, lim_a)

    blocks = []
    kb = k_blk
    bound = 1.0 / math.sqrt(out_dim * 3)
    for _ in range(num_blocks):
        kb, k1, k2 = jax.random.split(kb, 3)
        w1 = jax.random.uniform(k1, (out_dim, out_dim, 3), jnp.float32, -bound, bound)
        w2 = jax.random.uniform(k2, (out_dim, out_dim, 3), jnp.float32, -bound, bound)
        blocks.append(dict(
            # pre-transposed to (tap, in, out): tap 0 = prev, 1 = center, 2 = next
            w1T=jnp.transpose(w1, (2, 1, 0)),
            w2T=jnp.transpose(w2, (2, 1, 0)),
            g1=jnp.ones((1, out_dim), jnp.float32),
            b1=jnp.zeros((1, out_dim), jnp.float32),
            g2=jnp.ones((1, out_dim), jnp.float32),
            b2=jnp.zeros((1, out_dim), jnp.float32),
        ))
    return dict(W=W, W_edge=W_edge, a=a, blocks=blocks)


# ----------------------------------------------------------------------------
# Pure-JAX reference mirroring the PyTorch forward (for verification)
# ----------------------------------------------------------------------------
def reference_forward(h, mch_mask, comp_val, params):
    W, W_edge, a = params["W"], params["W_edge"], params["a"]
    D = W.shape[1]
    Wh = h @ W                                                      # (B,N,D)
    We = jnp.einsum("bijk,kd->bijd", comp_val, W_edge)              # (B,N,N,D)
    Wh1 = Wh @ a[:D]                                                # (B,N,1)
    Wh2 = Wh @ a[D:2 * D]                                           # (B,N,1)
    edge = (We @ a[2 * D:])[..., 0]                                 # (B,N,N)
    e = Wh1 + jnp.swapaxes(Wh2, -1, -2) + edge
    e = jnp.where(e >= 0, e, ALPHA * e)
    att = jnp.where(mch_mask > 0, e, NEG_BIG)
    att = jax.nn.softmax(att, axis=-1)
    x = jnp.einsum("bij,bjd->bid", att, Wh)                         # (B,N,D)

    def conv3(z, wT):
        zp = jnp.pad(z, ((0, 0), (1, 0), (0, 0)))[:, :-1, :]
        zn = jnp.pad(z, ((0, 0), (0, 1), (0, 0)))[:, 1:, :]
        return zp @ wT[0] + z @ wT[1] + zn @ wT[2]

    def bn(z, g, b):
        m = z.mean(axis=(0, 1), keepdims=True)
        v = ((z - m) ** 2).mean(axis=(0, 1), keepdims=True)
        return g * (z - m) / jnp.sqrt(v + BN_EPS) + b

    for blk in params["blocks"]:
        y = conv3(x, blk["w1T"])
        y = bn(y, blk["g1"], blk["b1"])
        y = jnp.maximum(y, 0.0)
        y = conv3(y, blk["w2T"])
        y = bn(y, blk["g2"], blk["b2"])
        x = jnp.maximum(y + x, 0.0)
    return x


if __name__ == "__main__":
    key = jax.random.PRNGKey(0)
    B, N, node_dim, edge_dim, out_dim = 2, 8, 32, 16, 32
    k_h, k_m, k_c, k_p = jax.random.split(key, 4)
    h = jax.random.normal(k_h, (B, N, node_dim), jnp.float32)
    comp_val = jax.random.normal(k_c, (B, N, N, edge_dim), jnp.float32)
    mch_mask = (jax.random.uniform(k_m, (B, N, N)) > 0.3).astype(jnp.float32)
    params = init_params(k_p, node_dim, edge_dim, out_dim, num_blocks=1)

    out = mch_attn_block_forward(h, mch_mask, comp_val, params)
    out = jax.block_until_ready(out)
    assert out.shape == (B, N, out_dim)

    ref = reference_forward(h, mch_mask, comp_val, params)
    if not bool(jnp.allclose(out, ref, atol=1e-3, rtol=1e-3)):
        err = float(jnp.max(jnp.abs(out - ref)))
        raise AssertionError(f"Pallas output does not match JAX reference (max |err|={err})")

    print("KERNEL_OK")
</pallas_src>

<mosaic_0001>
module attributes {stable_mosaic.version = 11 : i64} {
  func.func @attn_kernel(%arg0: i32, %arg1: memref<8x32xf32, #tpu.memory_space<vmem>>, %arg2: memref<1x8x8xf32, #tpu.memory_space<vmem>>, %arg3: memref<1x8x8xf32, #tpu.memory_space<vmem>>, %arg4: memref<32x128xf32, #tpu.memory_space<vmem>>, %arg5: memref<1x128xf32, #tpu.memory_space<vmem>>, %arg6: memref<1x128xf32, #tpu.memory_space<vmem>>, %arg7: memref<8x128xf32, #tpu.memory_space<vmem>>) attributes {dimension_semantics = [#tpu.dimension_semantics<parallel>], iteration_bounds = array<i64: 2>, scalar_prefetch = 0 : i64, scratch_operands = 0 : i64, tpu.core_type = #tpu.core_type<tc>, window_params = [{transform_indices = @transform_0, window_bounds = array<i64: 8, 32>}, {transform_indices = @transform_1, window_bounds = array<i64: 1, 8, 8>}, {transform_indices = @transform_2, window_bounds = array<i64: 1, 8, 8>}, {pipeline_mode = #tpu.pipeline_mode<synchronous>, transform_indices = @transform_3, window_bounds = array<i64: 32, 128>}, {pipeline_mode = #tpu.pipeline_mode<synchronous>, transform_indices = @transform_4, window_bounds = array<i64: 1, 128>}, {pipeline_mode = #tpu.pipeline_mode<synchronous>, transform_indices = @transform_5, window_bounds = array<i64: 1, 128>}, {transform_indices = @transform_6, window_bounds = array<i64: 8, 128>}]} {
    %c0 = arith.constant 0 : index
    %c0_0 = arith.constant 0 : index
    %0 = vector.load %arg1[%c0, %c0_0] : memref<8x32xf32, #tpu.memory_space<vmem>>, vector<8x32xf32>
    %c0_1 = arith.constant 0 : index
    %c0_2 = arith.constant 0 : index
    %1 = vector.load %arg4[%c0_1, %c0_2] : memref<32x128xf32, #tpu.memory_space<vmem>>, vector<32x128xf32>
    %cst = arith.constant dense<0.000000e+00> : vector<8x128xf32>
    %2 = tpu.matmul %0, %1, %cst {dimension_numbers = #tpu.dot_dimension_numbers<[1], [0], [0], [1], [0, 0, 1, 1], [], []>} : vector<8x32xf32>, vector<32x128xf32>, vector<8x128xf32> -> vector<8x128xf32>
    %3 = vector.shape_cast %2 : vector<8x128xf32> to vector<1x8x128xf32>
    %c0_3 = arith.constant 0 : index
    %c0_4 = arith.constant 0 : index
    %4 = vector.load %arg5[%c0_3, %c0_4] : memref<1x128xf32, #tpu.memory_space<vmem>>, vector<1x128xf32>
    %5 = vector.shape_cast %4 : vector<1x128xf32> to vector<1x1x128xf32>
    %6 = vector.broadcast %5 : vector<1x1x128xf32> to vector<1x8x128xf32>
    %7 = arith.mulf %3, %6 : vector<1x8x128xf32>
    %cst_5 = arith.constant dense<0.000000e+00> : vector<1x8xf32>
    %8 = vector.multi_reduction <add>, %7, %cst_5 [2] : vector<1x8x128xf32> to vector<1x8xf32>
    %9 = vector.shape_cast %8 : vector<1x8xf32> to vector<1x8x1xf32>
    %c0_6 = arith.constant 0 : index
    %c0_7 = arith.constant 0 : index
    %10 = vector.load %arg6[%c0_6, %c0_7] : memref<1x128xf32, #tpu.memory_space<vmem>>, vector<1x128xf32>
    %11 = vector.shape_cast %10 : vector<1x128xf32> to vector<1x1x128xf32>
    "tpu.trace_start"() <{level = 10 : i32, message = "bod,bnd->bon"}> : () -> ()
    %cst_8 = arith.constant dense<0.000000e+00> : vector<1x1x8xf32>
    %12 = tpu.matmul %11, %3, %cst_8 {dimension_numbers = #tpu.dot_dimension_numbers<[2], [2], [1], [1], [0, 0, 0, 1, 1, 1], [0], [0]>} : vector<1x1x128xf32>, vector<1x8x128xf32>, vector<1x1x8xf32> -> vector<1x1x8xf32>
    "tpu.trace_stop"() : () -> ()
    %13 = vector.broadcast %9 : vector<1x8x1xf32> to vector<1x8x8xf32>
    %14 = vector.broadcast %12 : vector<1x1x8xf32> to vector<1x8x8xf32>
    %15 = arith.addf %13, %14 : vector<1x8x8xf32>
    %c0_9 = arith.constant 0 : index
    %c0_10 = arith.constant 0 : index
    %c0_11 = arith.constant 0 : index
    %16 = vector.load %arg2[%c0_9, %c0_10, %c0_11] : memref<1x8x8xf32, #tpu.memory_space<vmem>>, vector<1x8x8xf32>
    %17 = arith.addf %15, %16 : vector<1x8x8xf32>
    %cst_12 = arith.constant 0.000000e+00 : f32
    %18 = vector.broadcast %cst_12 : f32 to vector<1x8x8xf32>
    %19 = arith.cmpf oge, %17, %18 : vector<1x8x8xf32>
    %cst_13 = arith.constant 2.000000e-01 : f32
    %20 = vector.broadcast %cst_13 : f32 to vector<1x8x8xf32>
    %21 = arith.mulf %20, %17 : vector<1x8x8xf32>
    %22 = arith.select %19, %17, %21 : vector<1x8x8xi1>, vector<1x8x8xf32>
    %c0_14 = arith.constant 0 : index
    %c0_15 = arith.constant 0 : index
    %c0_16 = arith.constant 0 : index
    %23 = vector.load %arg3[%c0_14, %c0_15, %c0_16] : memref<1x8x8xf32, #tpu.memory_space<vmem>>, vector<1x8x8xf32>
    %cst_17 = arith.constant 0.000000e+00 : f32
    %24 = vector.broadcast %cst_17 : f32 to vector<1x8x8xf32>
    %25 = arith.cmpf ogt, %23, %24 : vector<1x8x8xf32>
    %cst_18 = arith.constant -9.000000e+15 : f32
    %26 = vector.broadcast %cst_18 : f32 to vector<1x8x8xf32>
    %27 = arith.select %25, %22, %26 : vector<1x8x8xi1>, vector<1x8x8xf32>
    %cst_19 = arith.constant dense<0xFF800000> : vector<1x8xf32>
    %28 = vector.multi_reduction <maximumf>, %27, %cst_19 [2] : vector<1x8x8xf32> to vector<1x8xf32>
    %29 = vector.shape_cast %28 : vector<1x8xf32> to vector<1x8x1xf32>
    %30 = vector.broadcast %29 : vector<1x8x1xf32> to vector<1x8x8xf32>
    %31 = arith.subf %27, %30 : vector<1x8x8xf32>
    %32 = math.exp %31 : vector<1x8x8xf32>
    %cst_20 = arith.constant dense<0.000000e+00> : vector<1x8xf32>
    %33 = vector.multi_reduction <add>, %32, %cst_20 [2] : vector<1x8x8xf32> to vector<1x8xf32>
    %34 = vector.shape_cast %33 : vector<1x8xf32> to vector<1x8x1xf32>
    %35 = tpu.reciprocal %34 {approx = true} : vector<1x8x1xf32> -> vector<1x8x1xf32>
    %36 = arith.mulf %34, %35 : vector<1x8x1xf32>
    %cst_21 = arith.constant 2.000000e+00 : f32
    %37 = vector.broadcast %cst_21 : f32 to vector<1x8x1xf32>
    %38 = arith.subf %37, %36 : vector<1x8x1xf32>
    %39 = arith.mulf %35, %38 : vector<1x8x1xf32>
    %40 = vector.broadcast %39 : vector<1x8x1xf32> to vector<1x8x8xf32>
    %41 = arith.mulf %32, %40 : vector<1x8x8xf32>
    "tpu.trace_start"() <{level = 10 : i32, message = "bij,bjd->bid"}> : () -> ()
    %cst_22 = arith.constant dense<0.000000e+00> : vector<1x8x128xf32>
    %42 = tpu.matmul %41, %3, %cst_22 {dimension_numbers = #tpu.dot_dimension_numbers<[2], [1], [1], [2], [0, 0, 0, 1, 1, 2], [0], [0]>} : vector<1x8x8xf32>, vector<1x8x128xf32>, vector<1x8x128xf32> -> vector<1x8x128xf32>
    "tpu.trace_stop"() : () -> ()
    %43 = vector.shape_cast %42 : vector<1x8x128xf32> to vector<8x128xf32>
    %c0_23 = arith.constant 0 : index
    %c0_24 = arith.constant 0 : index
    %44 = vector.load %arg7[%c0_23, %c0_24] : memref<8x128xf32, #tpu.memory_space<vmem>>, vector<8x128xf32>
    tpu.vector_store %arg7[%c0_23, %c0_24], %43 {strides = array<i32>} : memref<8x128xf32, #tpu.memory_space<vmem>>, vector<8x128xf32>,
    return
  }
  func.func @transform_0(%arg0: i32) -> (i32, i32) {
    %c0_i32 = arith.constant 0 : i32
    %c0_i32_0 = arith.constant 0 : i32
    return %arg0, %c0_i32 : i32, i32
  }
  func.func @transform_1(%arg0: i32) -> (i32, i32, i32) {
    %c0_i32 = arith.constant 0 : i32
    %c0_i32_0 = arith.constant 0 : i32
    %c0_i32_1 = arith.constant 0 : i32
    return %arg0, %c0_i32, %c0_i32_0 : i32, i32, i32
  }
  func.func @transform_2(%arg0: i32) -> (i32, i32, i32) {
    %c0_i32 = arith.constant 0 : i32
    %c0_i32_0 = arith.constant 0 : i32
    %c0_i32_1 = arith.constant 0 : i32
    return %arg0, %c0_i32, %c0_i32_0 : i32, i32, i32
  }
  func.func @transform_3(%arg0: i32) -> (i32, i32) {
    %c0_i32 = arith.constant 0 : i32
    %c0_i32_0 = arith.constant 0 : i32
    %c0_i32_1 = arith.constant 0 : i32
    return %c0_i32, %c0_i32_0 : i32, i32
  }
  func.func @transform_4(%arg0: i32) -> (i32, i32) {
    %c0_i32 = arith.constant 0 : i32
    %c0_i32_0 = arith.constant 0 : i32
    %c0_i32_1 = arith.constant 0 : i32
    return %c0_i32, %c0_i32_0 : i32, i32
  }
  func.func @transform_5(%arg0: i32) -> (i32, i32) {
    %c0_i32 = arith.constant 0 : i32
    %c0_i32_0 = arith.constant 0 : i32
    %c0_i32_1 = arith.constant 0 : i32
    return %c0_i32, %c0_i32_0 : i32, i32
  }
  func.func @transform_6(%arg0: i32) -> (i32, i32) {
    %c0_i32 = arith.constant 0 : i32
    %c0_i32_0 = arith.constant 0 : i32
    return %arg0, %c0_i32 : i32, i32
  }
}

</mosaic_0001>

<bundles_post_ra>
// kernel: tpu_custom_call.1
= control target key start
LH: loop header
LB: loop body
LE: loop exit
PB: predicated region body
PF: predicated region fallthrough
CT: control target
= control target key end

     0   :  { %s1424_s0 = inlined_call_operand.hbm [shape: f32[16,32], index: 0, kind: input, shape index: {}]   ;;  %s1425_s1 = inlined_call_operand.hbm [shape: f32[2,8,8], index: 1, kind: input, shape index: {}]   ;;  %s1426_s2 = inlined_call_operand.hbm [shape: f32[2,8,8], index: 2, kind: input, shape index: {}]   ;;  %s1427_s3 = inlined_call_operand.hbm [shape: f32[32,128], index: 3, kind: input, shape index: {}]   ;;  %s1428_s4 = inlined_call_operand.vmem [shape: f32[1,128], index: 4, kind: input, shape index: {}]   ;;  %s1429_s5 = inlined_call_operand.vmem [shape: f32[1,128], index: 5, kind: input, shape index: {}]   ;;  %s1430_s6 = inlined_call_operand.hbm [shape: f32[16,128], index: 6, kind: output, shape index: {}]  }
   0x1   :  { %1449 = sst [smem:[#allocation21_spill]] %s1425_s1 }
   0x2   :  { %1450 = sst [smem:[#allocation22_spill]] %s1430_s6 }
   0x3   :  { %11 = vsyncpa [#allocation3], 0 }
   0x4   :  { %13 = vsyncpa [#allocation3 + $0x1], 0 }
   0x5   :  { %14 = vsyncpa [#allocation6], 0 }
   0x6   :  { %16 = vsyncpa [#allocation6 + $0x1], 0 }
   0x7   :  { %17 = vsyncpa [#allocation9], 0 }
   0x8   :  { %18 = vsyncpa [#allocation4], 0 }
   0x9   :  { %20 = vsyncpa [#allocation4 + $0x1], 0  ;;  %s1126_s21 = smov 0   ;;  %s1128_s22 = smov 0  }
   0xa   :  { %s1130_s23 = smov 0   ;;  %s1132_s24 = smov 0  }
   0xb LB: > { %1451 = sst [smem:[#allocation15_spill]] %s1067_s21  ;;  %s1147_s25 = sadd.s32 1, %s1079_s24   ;;  %s1079_s24 = sphi %s1132_s24, %s1482_s24   ;;  %s1075_s23 = sphi %s1130_s23, %s1486_s23   ;;  %s1071_s22 = sphi %s1128_s22, %s1485_s22   ;;  %s1067_s21 = sphi %s1126_s21, %s1484_s21  }
   0xc   : > { %1452 = sst [smem:[#allocation16_spill]] %s1079_s24  ;;  %s33_s26 = sadd.s32 1, %s1075_s23 }
   0xd   : > { %1453 = sst [smem:[#allocation17_spill]] %s1147_s25  ;;  %s30_s27 = ssub.s32 %s1079_s24, %s1147_s25 }
   0xe   : > { %p1431_p0 = scmp.ne.s32.totalorder %s1075_s23, %s1071_s22  ;;  %p31_p1 = scmp.eq.s32.totalorder %s30_s27, 0 }
   0xf   : > { %p41_p2 = scmp.eq.s32.totalorder %s1079_s24, 0  ;;  %p842_p4 = scmp.lt.s32.totalorder %s1079_s24, 2 }
  0x10   : > { %s1158_s28 = scalar_select %p31_p1, %s1075_s23, %s33_s26  }
  0x11   : > { %p42_p5 = por %p41_p2, %p1431_p0  ;;  %s1432_s29 = sand.u32 1, %s1075_s23  }
  0x12   : > { %1454 = sst [smem:[#allocation18_spill]] %s1158_s28  ;;  %s1166_s30 = sshll.u32 %s1432_s29, 3 }
  0x13   : > { %s1169_s7 = sshll.u32 %s1079_s24, 7  ;;  %p1171_p6 = pnand %p842_p4, %p42_p5 }
  0x14   : > { %s248_s9 = sand.u32 1, %s1079_s24   ;;  %s1456_s1 = sld [smem:[#allocation21_spill]] }
  0x15   : > { %s1455_s8 = scalar_select %p1171_p6, 1, 0 }
  0x16   : > { %s252_s13 = scalar_lea.vmem [#allocation5], %s1166_s30  ;;  %s1185_s15 = scalar_lea.sflag [#allocation6], %s248_s9 }
  0x17   : > { %s259_s14 = sshll.u32 %s252_s13, 4  ;;  %p1191_p8 = pneg %p1171_p6  ;;  %s1183_s14 = int_to_ptr.vmem [resolvable:$true] %s259_s14 }
  0x19   : > { %s1457_s17 = scalar_select %p1191_p8, 1, 0 }
  0x1a   : > { %s1180_s12 = scalar_lea.hbm %s1456_s1, %s1169_s7  ;;  %s892_s20 = scalar_lea.hbm %s1456_s1, 256 }
  0x1b   : > { %s887_s16 = scalar_lea.hbm %s1180_s12, 128  ;;  %p893_p11 = scmp.lt.u32.totalorder %s1180_s12, %s1456_s1 }
  0x1c   : > { %p888_p7 = scmp.ne.s32.totalorder %s1180_s12, %s887_s16  ;;  %p894_p12 = scmp.lt.u32.totalorder %s892_s20, %s887_s16 }
  0x1d   : > { %p896_p1 = scmp.lt.u32.totalorder %s887_s16, %s1180_s12 }
  0x1e   : > { %p890_p9 = pnand %p1191_p8, %p888_p7  ;;  %p895_p13 = por %p894_p12, %p893_p11 }
  0x20   : > { %p891_p10 = pneg %p890_p9  ;;  %p897_p2 = por %p896_p1, %p895_p13 }
  0x22   : > { %p898_p4 = pnand %p897_p2, %p891_p10 }
  0x24   : > { %901 = shalt.err (!%p898_p4)
}
  0x25   : > { %s902_s9 = scalar_lea.vmem %s1183_s14, 128  ;;  %s1081_s10 = smov [#allocation5]  }
  0x26   : > { %p903_p5 = scmp.ne.s32.totalorder %s1183_s14, %s902_s9  ;;  %s907_s11 = sshll.u32 %s1081_s10, 4  ;;  %s908_s11 = int_to_ptr.vmem [resolvable:$false] %s907_s11 }
  0x27   : > { %s909_s13 = scalar_lea.vmem %s908_s11, 256  ;;  %p910_p3 = scmp.lt.s32.totalorder %s1183_s14, %s908_s11 }
  0x28   : > { %p905_p7 = pnand %p903_p5, %p1191_p8  ;;  %p911_p0 = scmp.lt.s32.totalorder %s909_s13, %s902_s9 }
  0x2a   : > { %p906_p9 = pneg %p905_p7  ;;  %p912_p11 = por %p911_p0, %p910_p3 }
  0x2c   : > { %p913_p12 = pnand %p912_p11, %p906_p9 }
  0x2e   : > { %916 = shalt.err (!%p913_p12)
}
  0x2f   : > { %833 = dma.hbm_to_vmem [thread:$0]  (!%p1171_p6), %s1180_s12, 128, %s1183_s14, %s1185_s15  }
  0x30   : > { %s1216_s16 = sadd.s32 4294967295, %s1079_s24   ;;  %s752_s18 = sadd.s32 4294967294, %s1079_s24  }
  0x31   : > { %p46_p0 = scmp.ne.s32.totalorder %s1071_s22, %s1067_s21  ;;  %p1438_p3 = scmp.eq.s32.totalorder %s1216_s16, 0 }
  0x32   : > { %p185_p10 = scmp.eq.s32.totalorder %s1216_s16, 1  ;;  %p191_p13 = scmp.eq.s32.totalorder %s752_s18, 1 }
  0x33   : > { %p1225_p1 = por %p1438_p3, %p46_p0  ;;  %p753_p2 = scmp.ge.s32.totalorder %s1079_s24, 1 }
  0x34   : > { %p1459_p4 = scmp.ne.s32.totalorder %s1075_s23, %s1071_s22  ;;  %p1237_p7 = por %p191_p13, %p46_p0 }
  0x35   : > { %s1458_s19 = scalar_select %p1225_p1, 1, 0 }
  0x36   : > { %p1233_p5 = por %p185_p10, %p1459_p4  ;;  %p198_p9 = scmp.lt.s32.totalorder %s1079_s24, 3 }
  0x37   : > { %s1462_s14 = scalar_select %p1237_p7, 1, 0 }
  0x38   : > { %s1460_s12 = scalar_select %p1233_p5, 1, 0 }
  0x39   : > { %1463 = sst [smem:[#allocation20_spill]] %s1462_s14  ;;  %p1242_p11 = pnand %p753_p2, %p198_p9 }
  0x3a   : > { %1461 = sst [smem:[#allocation19_spill]] %s1460_s12  ;;  %s1082_s26 = smov [#allocation8]  }
  0x3b   : > { %s1464_s20 = scalar_select %p1242_p11, 1, 0 }
  0x3c   : > { %s210_s27 = sshll.u32 %s1082_s26, 4  ;;  %p823_p12 = pneg %p1242_p11  ;;  %s1246_s27 = int_to_ptr.vmem [resolvable:$true] %s210_s27 }
  0x3d   : > { %s1254_s11 = scalar_lea.hbm %s1424_s0, %s1169_s7  ;;  %s234_s18 = scalar_lea.vmem [#allocation2], %s1166_s30 }
  0x3e   : > { %p1258_p0 = pnand %p823_p12, %p1438_p3  ;;  %s241_s29 = sshll.u32 %s234_s18, 4  ;;  %s1263_s29 = int_to_ptr.vmem [resolvable:$true] %s241_s29 }
  0x3f   : > { %s1269_s28 = scalar_lea.hbm %s1426_s2, %s1169_s7  ;;  %s917_s9 = scalar_lea.hbm %s1427_s3, 512 }
  0x40   : > { %p918_p10 = scmp.ne.s32.totalorder %s1427_s3, %s917_s9  ;;  %p919_p13 = pneg %p1258_p0 }
  0x41   : > { %p924_p9 = scmp.lt.u32.totalorder %s917_s9, %s1427_s3 }
  0x42   : > { %p920_p2 = pnand %p919_p13, %p918_p10 }
  0x44   : > { %p921_p4 = pneg %p920_p2 }
  0x46   : > { %p926_p12 = pnand %p924_p9, %p921_p4 }
  0x48   : > { %929 = shalt.err (!%p926_p12)
}
  0x49   : > { %s930_s1 = scalar_lea.vmem %s1246_s27, 512  ;;  %p938_p1 = scmp.lt.s32.totalorder %s1246_s27, %s1246_s27 }
  0x4a   : > { %p931_p3 = scmp.ne.s32.totalorder %s1246_s27, %s930_s1  ;;  %p939_p11 = scmp.lt.s32.totalorder %s930_s1, %s930_s1 }
  0x4c   : > { %p933_p7 = pnand %p931_p3, %p919_p13  ;;  %p940_p6 = por %p939_p11, %p938_p1 }
  0x4e   : > { %p934_p5 = pneg %p933_p7 }
  0x50   : > { %p941_p8 = pnand %p940_p6, %p934_p5 }
  0x52   : > { %944 = shalt.err (!%p941_p8)
}
  0x53   : > { %s1083_s24 = smov 128   ;;  %s1084_s21 = smov 8  }
  0x54   : > { %826 = dma.hbm_to_vmem [thread:$0]  (!%p1258_p0), %s1427_s3, 512, %s1246_s27, [#allocation9], %s1083_s24, %s1083_s24, %s1084_s21  }
  0x55   : > { %s1466_s14 = sand.u32 1, %s1075_s23   ;;  %s945_s9 = scalar_lea.hbm %s1254_s11, 128 }
  0x56   : > { %s231_s26 = scalar_lea.sflag [#allocation3], %s1466_s14  ;;  %p946_p6 = scmp.ne.s32.totalorder %s1254_s11, %s945_s9 }
  0x57   : > { %p1467_p8 = scmp.ne.s32.totalorder %s1457_s17, 0  ;;  %s950_s1 = scalar_lea.hbm %s1424_s0, 256 }
  0x58   : > { %p951_p5 = scmp.lt.u32.totalorder %s1254_s11, %s1424_s0  ;;  %p952_p7 = scmp.lt.u32.totalorder %s950_s1, %s945_s9 }
  0x59   : > { %p948_p3 = pnand %p946_p6, %p1467_p8  ;;  %p954_p10 = scmp.lt.u32.totalorder %s945_s9, %s1254_s11 }
  0x5a   : > { %p953_p11 = por %p952_p7, %p951_p5 }
  0x5b   : > { %p949_p1 = pneg %p948_p3 }
  0x5c   : > { %p955_p13 = por %p954_p10, %p953_p11 }
  0x5e   : > { %p956_p0 = pnand %p955_p13, %p949_p1 }
  0x60   : > { %959 = shalt.err (!%p956_p0)
}
  0x61   : > { %s960_s27 = scalar_lea.vmem %s1263_s29, 128  ;;  %s1085_s13 = smov [#allocation2]  }
  0x62   : > { %p961_p2 = scmp.ne.s32.totalorder %s1263_s29, %s960_s27  ;;  %s965_s24 = sshll.u32 %s1085_s13, 4  ;;  %s966_s24 = int_to_ptr.vmem [resolvable:$false] %s965_s24 }
  0x63   : > { %s967_s6 = scalar_lea.vmem %s966_s24, 256  ;;  %p968_p12 = scmp.lt.s32.totalorder %s1263_s29, %s966_s24 }
  0x64   : > { %p963_p4 = pnand %p961_p2, %p1467_p8  ;;  %p969_p6 = scmp.lt.s32.totalorder %s967_s6, %s960_s27 }
  0x66   : > { %p964_p9 = pneg %p963_p4  ;;  %p970_p3 = por %p969_p6, %p968_p12 }
  0x68   : > { %p971_p5 = pnand %p970_p3, %p964_p9 }
  0x6a   : > { %974 = shalt.err (!%p971_p5)
}
  0x6b   : > { %p1468_p1 = scmp.ne.s32.totalorder %s1455_s8, 0  ;;  %s270_s12 = scalar_lea.vmem [#allocation7], %s1166_s30 }
  0x6c   : > { %s277_s21 = sshll.u32 %s270_s12, 4  ;;  %s975_s25 = scalar_lea.hbm %s1269_s28, 128  ;;  %s278_s21 = int_to_ptr.vmem [resolvable:$true] %s277_s21 }
  0x6d   : > { %830 = dma.hbm_to_vmem [thread:$0]  (!%p1468_p1), %s1254_s11, 128, %s1263_s29, %s231_s26  }
  0x6e   : > { %p976_p7 = scmp.ne.s32.totalorder %s1269_s28, %s975_s25  ;;  %s980_s9 = scalar_lea.hbm %s1426_s2, 256 }
  0x6f   : > { %p981_p13 = scmp.lt.u32.totalorder %s1269_s28, %s1426_s2  ;;  %p982_p0 = scmp.lt.u32.totalorder %s980_s9, %s975_s25 }
  0x70   : > { %p978_p11 = pnand %p976_p7, %p1467_p8  ;;  %p984_p4 = scmp.lt.u32.totalorder %s975_s25, %s1269_s28 }
  0x71   : > { %p983_p2 = por %p982_p0, %p981_p13 }
  0x72   : > { %p979_p10 = pneg %p978_p11 }
  0x73   : > { %p985_p9 = por %p984_p4, %p983_p2 }
  0x75   : > { %p986_p12 = pnand %p985_p9, %p979_p10 }
  0x77   : > { %989 = shalt.err (!%p986_p12)
}
  0x78   : > { %s990_s29 = scalar_lea.vmem %s278_s21, 128  ;;  %s1086_s30 = smov [#allocation7]  }
  0x79   : > { %p991_p6 = scmp.ne.s32.totalorder %s278_s21, %s990_s29  ;;  %s995_s11 = sshll.u32 %s1086_s30, 4  ;;  %s996_s11 = int_to_ptr.vmem [resolvable:$false] %s995_s11 }
  0x7a   : > { %s997_s26 = scalar_lea.vmem %s996_s11, 256  ;;  %p998_p7 = scmp.lt.s32.totalorder %s278_s21, %s996_s11 }
  0x7b   : > { %p993_p3 = pnand %p991_p6, %p1467_p8  ;;  %p999_p11 = scmp.lt.s32.totalorder %s997_s26, %s990_s29 }
  0x7d   : > { %p994_p5 = pneg %p993_p3  ;;  %p1000_p1 = por %p999_p11, %p998_p7 }
  0x7f   : > { %p1001_p0 = pnand %p1000_p1, %p994_p5 }
  0x81   : > { %1004 = shalt.err (!%p1001_p0)
}
  0x82   : > { %p1469_p13 = scmp.ne.s32.totalorder %s1455_s8, 0  ;;  %p1470_p10 = scmp.ne.s32.totalorder %s1464_s20, 0 }
  0x83   : > { %s1337_s17 = sand.u32 (!%p1470_p10), 1, %s1071_s22   ;;  %p1471_p8 = scmp.ne.s32.totalorder (!%p1470_p10), %s1458_s19, 0 }
  0x84   : > { %836 = dma.hbm_to_vmem [thread:$0]  (!%p1469_p13), %s1269_s28, 128, %s278_s21, %s1185_s15  }
  0x85   : > { %286 = sbr.rel (%p1470_p10) target bundleno = 1140 (0x474), region = 44  ;;  %s1340_s1 = sshll.u32 (!%p1470_p10), %s1337_s17, 3 }
  0x86   : > { %s289_s27 = scalar_lea.sflag (!%p1470_p10), [#allocation3], %s1337_s17  ;;  %s292_s13 = scalar_lea.vmem (!%p1470_p10), [#allocation2], %s1340_s1 }
  0x8c   : > { %1050 = dma.done.wait (%p1471_p8), %s289_s27, 128  }
  0x8d   : > { %1052 = vsyncadd (%p1471_p8), %s289_s27, 4294967168  ;;  %s297_s28 = sand.u32 1, %s1216_s16   ;;  %s301_s15 = scalar_lea.vmem [#allocation5], %s1340_s1 }
  0x8e   : > { %s298_s8 = scalar_lea.sflag [#allocation6], %s297_s28 }
  0x8f   : > { %1054 = dma.done.wait (%p1471_p8), %s298_s8, 256  }
  0x90   : > { %1056 = vsyncadd (%p1471_p8), %s298_s8, 4294967040  ;;  %s310_s20 = scalar_lea.vmem [#allocation7], %s1340_s1  ;;  %p1472_p1 = scmp.eq.s32.totalorder %s1216_s16, 0 }
  0x92   : > { %1058 = dma.done.wait (%p1472_p1), [#allocation9], 512   ;;  %p1473_p2 = pmov %p1472_p1 }
  0x93   : > { %v1087_v0 = vmov 0.0|0.0   ;;  %vm1088_vm0 = vmmov 0   ;;  %v1089_v1 = vmov 0.0   ;;  %v354_v2 = vld [vmem:[#allocation8] sm:$0xff]  ;;  %v355_v3 = vld [vmem:[#allocation8 + $0x8] sm:$0xff]  ;;  %v356_v4 = vld [vmem:[#allocation8 + $0x10] sm:$0xff]  ;;  %v513_v14 = vlaneseq }
  0x94   : > { %1060 = vsyncadd (%p1473_p2), [#allocation9], 4294966784  ;;  %805 = vmatprep.subr.bf16.mxu0 %v1087_v0  ;;  %792 = vmatprep.mubr.msk.f32.mxu0 %vm1088_vm0, %v1089_v1  ;;  %v806_v5 = vpack.c.bf16 %v355_v3, %v354_v2  ;;  %v357_v6 = vld [vmem:[#allocation8 + $0x18] sm:$0xff]  ;;  %vm358_vm1 = vcmask 261120   ;;  %v769_v9 = vld [vmem:[%s1428_s4] ss:$0 sm:$0xff] }
  0x95   : > { %795 = vmatprep.subr.mxu1 %v1089_v1  ;;  %797 = vmatprep.mubr.msk.f32.mxu1 %vm1088_vm0, %v1089_v1  ;;  %v809_v7 = vpack.c.bf16 %v357_v6, %v356_v4  ;;  %v353_v8 = vld [vmem:[%s292_s13] sm:$0xff]  ;;  %v514_v15 = vshrl.u32 %v513_v14, 7  ;;  %v518_v21 = vld [vmem:[%s301_s15] sm:$0xff]  ;;  %vm526_vm4 = vcmask 64512   ;;  %s1474_s21 = sld [smem:[#allocation19_spill]]  ;;  %s352_s25 = scalar_lea.vmem [#allocation10], %s1340_s1 }
  0x96   : > { %807 = vmatpush3.bf16.msra.mxu0 %v806_v5  ;;  %v442_v13 = vld [vmem:[%s1429_s5] sm:$0x1]  ;;  %s629_s7 = sshll.u32 %s352_s25, 4  ;;  %s772_s14 = sshll.u32 %s1216_s16, 7  ;;  %s1377_s7 = int_to_ptr.vmem [resolvable:$true] %s629_s7 }
  0x97   : > { %808 = vmatprep.subr.bf16.mxu0 %v1087_v0  ;;  %v515_v16 = vsub.s32 0, %v514_v15  ;;  %v523_v23 = vld [vmem:[%s310_s20] sm:$0xff]  ;;  %s1475_s18 = sld [smem:[#allocation22_spill]]  ;;  %s616_s30 = scalar_lea.sflag [#allocation4], %s1337_s17 }
  0x98   : > { %vm524_vm3 = vcmp.gt.f32.partialorder %v523_v23, 0.0  ;;  %s1005_s11 = scalar_lea.vmem %s1377_s7, 128  ;;  %s1090_s16 = smov [#allocation10]  }
  0x99   : > { %p1006_p4 = scmp.ne.s32.totalorder %s1377_s7, %s1005_s11  ;;  %s1009_s26 = sshll.u32 %s1090_s16, 4  ;;  %s1010_s26 = int_to_ptr.vmem [resolvable:$false] %s1009_s26 }
  0x9a   : > { %810 = vmatpush3.bf16.msra.mxu0 %v809_v7  ;;  %s1011_s1 = scalar_lea.vmem %s1010_s26, 256  ;;  %p1012_p3 = scmp.lt.s32.totalorder %s1377_s7, %s1010_s26 }
  0x9b   : > { %p1476_p9 = scmp.ne.s32.totalorder %s1474_s21, 0  ;;  %p1013_p5 = scmp.lt.s32.totalorder %s1011_s1, %s1005_s11 }
  0x9d   : > { %793 = vmatmul.mubr.msk.f32.vlgmr.msra.gmra.mrb[0].mxu0 %vm358_vm1, %v353_v8  ;;  %s1382_s29 = scalar_lea.hbm %s1475_s18, %s772_s14  ;;  %p1007_p12 = pnand %p1006_p4, %p1476_p9 }
  0x9e   : > { %p1014_p7 = por %p1013_p5, %p1012_p3 }
  0x9f   : > { %p1008_p6 = pneg %p1007_p12 }
  0xa1   : > { %p1015_p11 = pnand %p1014_p7, %p1008_p6 }
 0x170   : > { %v428_v10 = vpop.f32.mrb[0].mxu0 }
 0x171   : > { %v794_v11 = vpop.f32.mrb[1].mxu0  ;;  %796 = vmatpush3.xpose.msra.mxu1 %v428_v10  ;;  %v439_v12 = vmul.f32 %v769_v9, %v428_v10 }
 0x172   : > { %800 = vmatprep.subr.mxu1 %v1089_v1 }
 0x173   : > { %440 = vadd.xlane.f32.xlu0 %v439_v12 }
 0x174   : > { %798 = vmatmul.mubr.f32.vlgmr.msra.gmra.mrb[0].mxu1 %v442_v13 }
 0x175   : > { %801 = vmatpush3.msra.mxu1 %v428_v10  ;;  %802 = vmatprep.mubr.msk.f32.mxu1 %vm1088_vm0, %v1089_v1 }
 0x200   : > { %v441_v20 = vpop.xlane.xlu0 %440 }
 0x247   : > { %v509_v17 = vpop.f32.mrb[0].mxu1 }
 0x248   : > { %v516_v18 = vrot.slane %v509_v17, %v515_v16  ;;  %v799_v19 = vpop.f32.mrb[1].mxu1 }
 0x24a   : > { %v517_v22 = vadd.f32 %v516_v18, %v441_v20 }
 0x24c   : > { %v519_v24 = vadd.f32 %v518_v21, %v517_v22 }
 0x24e   : > { %vm520_vm2 = vcmp.ge.f32.partialorder %v519_v24, 0.0  ;;  %v521_v25 = vmul.f32 0.2, %v519_v24 }
 0x250   : > { %v522_v26 = vsel %vm520_vm2, %v519_v24, %v521_v25 }
 0x251   : > { %v525_v27 = vsel %vm524_vm3, %v522_v26, -9e+15 }
 0x252   : > { %v527_v28 = vsel %vm526_vm4, %v525_v27, -inf }
 0x253   : > { %528 = vmax.xlane.f32.xlu0 %v527_v28 }
 0x2e0   : > { %v529_v29 = vpop.xlane.xlu0 %528 }
 0x2e1   : > { %v530_v30 = vsub.f32 %v525_v27, %v529_v29 }
 0x2e3   : > { %v531_v31 = vmul.f32 1.442695, %v530_v30 }
 0x2e5   : > { %883 = vpow2.f32 %v531_v31 }
 0x2ef   : > { %v884_v32 = vpop.eup %883 }
 0x2f0   : > { %v533_v33 = vsel %vm526_vm4, %v884_v32, 0.0 }
 0x2f1   : > { %534 = vadd.xlane.f32.xlu1 %v533_v33 }
 0x37e   : > { %v535_v34 = vpop.xlane.xlu1 %534 }
 0x37f   : > { %885 = vrcp.f32 %v535_v34 }
 0x389   : > { %v886_v35 = vpop.eup %885 }
 0x38a   : > { %v537_v36 = vmul.f32 %v886_v35, %v535_v34 }
 0x38c   : > { %v538_v37 = vsub.f32 2.0, %v537_v36 }
 0x38e   : > { %v539_v38 = vmul.f32 %v886_v35, %v538_v37 }
 0x390   : > { %v540_v39 = vmul.f32 %v884_v32, %v539_v38 }
 0x392   : > { %803 = vmatmul.mubr.msk.f32.vlgmr.msra.gmra.mrb[2].mxu1 %vm526_vm4, %v540_v39 }
 0x465   : > { %v610_v40 = vpop.f32.mrb[2].mxu1 }
 0x466   : > { %614 = vst [vmem:[%s352_s25] sm:$0xff] %v610_v40  ;;  %v804_v41 = vpop.f32.mrb[3].mxu1 }
 0x467   : > { %1018 = shalt.err (!%p1015_p11)
}
 0x468   : > { %s1019_s17 = scalar_lea.hbm %s1382_s29, 128  ;;  %s1023_s28 = scalar_lea.hbm %s1475_s18, 256 }
 0x469   : > { %p1020_p0 = scmp.ne.s32.totalorder %s1382_s29, %s1019_s17  ;;  %p1024_p8 = scmp.lt.u32.totalorder %s1382_s29, %s1475_s18 }
 0x46a   : > { %p1025_p1 = scmp.lt.u32.totalorder %s1023_s28, %s1019_s17  ;;  %p1027_p4 = scmp.lt.u32.totalorder %s1019_s17, %s1382_s29 }
 0x46b   : > { %p1021_p13 = pnand %p1020_p0, %p1476_p9 }
 0x46c   : > { %p1026_p2 = por %p1025_p1, %p1024_p8 }
 0x46d   : > { %p1022_p10 = pneg %p1021_p13 }
 0x46e   : > { %p1028_p12 = por %p1027_p4, %p1026_p2 }
 0x470   : > { %p1029_p6 = pnand %p1028_p12, %p1022_p10 }
 0x472   : > { %1032 = shalt.err (!%p1029_p6)
}
 0x473   : > { %821 = dma.vmem_to_hbm [thread:$0]  (%p1476_p9), %s1377_s7, 128, %s1382_s29, %s616_s30  }
 0x474 PF: > { %s1477_s20 = sld [smem:[#allocation15_spill]]  ;;  %s1478_s19 = sld [smem:[#allocation20_spill]] }
 0x475   : > { %s1479_s24 = sld [smem:[#allocation16_spill]] }
 0x47a   : > { %s641_s6 = sand.u32 1, %s1477_s20   ;;  %p1480_p3 = scmp.ne.s32.totalorder %s1478_s19, 0 }
 0x47b   : > { %p1481_p5 = scmp.ge.s32.totalorder %s1479_s24, 2  ;;  %s642_s12 = scalar_lea.sflag [#allocation4], %s641_s6 }
 0x47d   : > { %p838_p7 = pnand %p1481_p5, %p1480_p3 }
 0x47f   : > { %1062 = dma.done.wait (!%p838_p7), %s642_s12, 128  }
 0x480   : > { %1064 = vsyncadd (!%p838_p7), %s642_s12, 4294967168  ;;  %s1482_s24 = sld [smem:[#allocation17_spill]]  ;;  %s1483_s25 = sld [smem:[#allocation18_spill]] }
 0x481   : > { %s1484_s21 = smov %s1071_s22  ;;  %s1485_s22 = smov %s1075_s23 }
 0x486   : > { %p23_p11 = scmp.ge.s32.totalorder %s1482_s24, 4   ;;  %s1486_s23 = smov %s1483_s25 }
 0x488   :  { %25 = sbr.rel (!%p23_p11) target bundleno = 11 (0xb), region = 117 }
 0x48f   :  { %647 = vsyncpa [#allocation3], 1 }
 0x490   :  { %649 = vsyncpa [#allocation3 + $0x1], 1 }
 0x491   :  { %650 = vsyncpa [#allocation6], 1 }
 0x492   :  { %652 = vsyncpa [#allocation6 + $0x1], 1 }
 0x493   :  { %653 = vsyncpa [#allocation9], 1 }
 0x494   :  { %654 = vsyncpa [#allocation4], 1 }
 0x495   :  { %656 = vsyncpa [#allocation4 + $0x1], 1 }

</bundles_post_ra>
